<compile_context>
chip_gen: v5e
topology: v5e:2x2
jax: 0.10.0
libtpu: 0.0.40
codegen_flags: <defaults>
</compile_context>

<pallas_src>
import functools

import jax
import jax.numpy as jnp
from jax import lax
from jax.experimental import pallas as pl
from jax.experimental.pallas import tpu as pltpu


# ----------------------------------------------------------------------------
# Pallas kernels: tiled matmul + bias (+ ReLU) (+ fused inverted-dropout mask)
# ----------------------------------------------------------------------------
def _linear_kernel(x_ref, w_ref, b_ref, o_ref, acc_ref, *, relu):
    @pl.when(pl.program_id(2) == 0)
    def _init():
        acc_ref[...] = jnp.zeros_like(acc_ref)

    acc_ref[...] += jnp.dot(x_ref[...], w_ref[...],
                            preferred_element_type=jnp.float32)

    @pl.when(pl.program_id(2) == pl.num_programs(2) - 1)
    def _epilogue():
        y = acc_ref[...] + b_ref[...]          # (1, tn) broadcasts over rows
        if relu:
            y = jnp.maximum(y, 0.0)
        o_ref[...] = y.astype(o_ref.dtype)


def _linear_dropout_kernel(x_ref, w_ref, b_ref, m_ref, o_ref, acc_ref, *, relu):
    @pl.when(pl.program_id(2) == 0)
    def _init():
        acc_ref[...] = jnp.zeros_like(acc_ref)

    acc_ref[...] += jnp.dot(x_ref[...], w_ref[...],
                            preferred_element_type=jnp.float32)

    @pl.when(pl.program_id(2) == pl.num_programs(2) - 1)
    def _epilogue():
        y = acc_ref[...] + b_ref[...]
        if relu:
            y = jnp.maximum(y, 0.0)
        y = y * m_ref[...]                     # mask already scaled by 1/(1-p)
        o_ref[...] = y.astype(o_ref.dtype)


# ----------------------------------------------------------------------------
# Wrapper: padding, tiling, bf16 operand cast, pallas_call plumbing
# ----------------------------------------------------------------------------
def _round_up(x, m):
    return ((x + m - 1) // m) * m


def _pick_tile(dim, target, align):
    return target if dim >= target else _round_up(dim, align)


def pallas_linear(x, w, b, *, relu=False, dropout_mask=None,
                  compute_dtype=jnp.bfloat16):
    """y = x @ w + b, optional ReLU, optional fused inverted-dropout mask.

    x: (M, K) f32, w: (K, N) f32 (already transposed vs. nn.Linear), b: (N,),
    dropout_mask: (M, N) f32 of {0, 1/(1-p)} or None.  Returns (M, N) f32.
    """
    M, K = x.shape
    Kw, N = w.shape
    assert K == Kw and b.shape == (N,)

    sublane = 16 if compute_dtype == jnp.bfloat16 else 8
    tm = _pick_tile(M, 256, sublane)
    tn = _pick_tile(N, 512, 128)
    tk = _pick_tile(K, 1024 if compute_dtype == jnp.bfloat16 else 512, 128)
    Mp, Np, Kp = _round_up(M, tm), _round_up(N, tn), _round_up(K, tk)

    xp = jnp.zeros((Mp, Kp), compute_dtype).at[:M, :K].set(x.astype(compute_dtype))
    wp = jnp.zeros((Kp, Np), compute_dtype).at[:K, :N].set(w.astype(compute_dtype))
    bp = jnp.zeros((1, Np), jnp.float32).at[0, :N].set(b.astype(jnp.float32))

    grid = (Mp // tm, Np // tn, Kp // tk)
    x_spec = pl.BlockSpec((tm, tk), lambda i, j, k: (i, k))
    w_spec = pl.BlockSpec((tk, tn), lambda i, j, k: (k, j))
    b_spec = pl.BlockSpec((1, tn), lambda i, j, k: (0, j))
    o_spec = pl.BlockSpec((tm, tn), lambda i, j, k: (i, j))

    itemsize = jnp.dtype(compute_dtype).itemsize
    cost = pl.CostEstimate(
        flops=2 * Mp * Kp * Np,
        transcendentals=0,
        bytes_accessed=(Mp * Kp + Kp * Np) * itemsize + Mp * Np * 4)

    common = dict(
        out_shape=jax.ShapeDtypeStruct((Mp, Np), jnp.float32),
        out_specs=o_spec,
        scratch_shapes=[pltpu.VMEM((tm, tn), jnp.float32)],
        compiler_params=pltpu.CompilerParams(
            dimension_semantics=("parallel", "parallel", "arbitrary")),
        cost_estimate=cost,
    )

    if dropout_mask is None:
        out = pl.pallas_call(
            functools.partial(_linear_kernel, relu=relu),
            grid=grid,
            in_specs=[x_spec, w_spec, b_spec],
            **common,
        )(xp, wp, bp)
    else:
        mp = jnp.zeros((Mp, Np), jnp.float32).at[:M, :N].set(
            dropout_mask.astype(jnp.float32))
        out = pl.pallas_call(
            functools.partial(_linear_dropout_kernel, relu=relu),
            grid=grid,
            in_specs=[x_spec, w_spec, b_spec, o_spec],
            **common,
        )(xp, wp, bp, mp)

    return out[:M, :N]


def jnp_linear(x, w, b, *, relu=False, dropout_mask=None,
               compute_dtype=jnp.bfloat16):
    """Pure-JAX reference with the same operand casting as the kernel."""
    y = jnp.dot(x.astype(compute_dtype), w.astype(compute_dtype),
                preferred_element_type=jnp.float32) + b[None, :]
    if relu:
        y = jnp.maximum(y, 0.0)
    if dropout_mask is not None:
        y = y * dropout_mask
    return y


# ----------------------------------------------------------------------------
# VGG building blocks (layout plumbing in plain JAX, all matmuls via Pallas)
# ----------------------------------------------------------------------------
def _im2col_3x3(x):
    """(B, C, H, W) NCHW -> (B*H*W, C*9) patches, pad=1 (PyTorch conv layout)."""
    B, C, H, W = x.shape
    xp = jnp.pad(x, ((0, 0), (0, 0), (1, 1), (1, 1)))
    cols = [xp[:, :, kh:kh + H, kw:kw + W] for kh in range(3) for kw in range(3)]
    patches = jnp.stack(cols, axis=2)           # (B, C, 9, H, W); 9 = kh*3+kw
    patches = patches.transpose(0, 3, 4, 1, 2)  # (B, H, W, C, 9)
    return patches.reshape(B * H * W, C * 9)    # flat index = ci*9 + kh*3 + kw


def conv_block_forward(x, blk, linear_fn):
    """ConvBlock: Conv2d(3x3, pad=1) [+ folded BN] + ReLU + AvgPool2d(pool)."""
    B, C, H, W = x.shape
    w, b = blk["w"], blk["b"]                   # (Co, C, 3, 3), (Co,)
    Co = w.shape[0]
    if blk["bn"] is not None:
        # Inference-mode BatchNorm folded into the conv weights/bias.
        # TODO(synk): training-mode BatchNorm (batch stats + running update) not implemented.
        gamma, beta, mean, var = blk["bn"]
        scale = gamma / jnp.sqrt(var + 1e-5)
        w = w * scale[:, None, None, None]
        b = (b - mean) * scale + beta
    cols = _im2col_3x3(x)                       # (B*H*W, C*9)
    w2d = w.reshape(Co, C * 9).T                # (C*9, Co)
    y = linear_fn(cols, w2d, b, relu=True)      # conv + bias + ReLU on the MXU
    y = y.reshape(B, H, W, Co).transpose(0, 3, 1, 2)
    p = blk["pool"]
    if p > 1:
        # TODO(synk): AvgPool2d stays in plain JAX (pure data movement, no MXU work).
        y = y.reshape(B, Co, H // p, p, W // p, p).mean(axis=(3, 5))
    return y


def vgg_forward(params, x, *, training=False, rng=None, linear_fn=pallas_linear):
    """Full VGG forward: ConvBlocks -> FcBlocks -> end_layers."""
    drop_counter = [0]

    def next_mask(shape):
        if not training:
            return None                          # nn.Dropout is identity in eval
        k = jax.random.fold_in(rng, drop_counter[0])
        drop_counter[0] += 1
        keep = jax.random.bernoulli(k, p=0.5, shape=shape)
        return keep.astype(jnp.float32) / 0.5    # inverted dropout, p = 0.5

    fwd = x
    for blk in params["conv_blocks"]:
        fwd = conv_block_forward(fwd, blk, linear_fn)

    B = fwd.shape[0]
    fwd = fwd.reshape(B, -1)                     # Flatten (first FcBlock)

    for blk in params["fc_blocks"]:              # Linear + ReLU + Dropout
        mask = next_mask((B, blk["w"].shape[1]))
        fwd = linear_fn(fwd, blk["w"], blk["b"], relu=True, dropout_mask=mask)

    e1, e2 = params["end"]                       # Linear + Dropout + Linear
    mask = next_mask((B, e1["w"].shape[1]))
    fwd = linear_fn(fwd, e1["w"], e1["b"], relu=False, dropout_mask=mask)
    fwd = linear_fn(fwd, e2["w"], e2["b"], relu=False, dropout_mask=None)
    return fwd


# ----------------------------------------------------------------------------
# Parameter init (mirrors VGG.initialize_weights)
# ----------------------------------------------------------------------------
def init_vgg_params(key, cfg):
    keys = iter(jax.random.split(key, 64))
    conv_blocks = []
    in_ch, cur = 3, cfg["input_size"]
    for layer_id, ch in enumerate(cfg["conv_channels"]):
        pool = cfg["max_pool_sizes"][layer_id]
        if pool == 2:
            cur //= 2
        n = 3 * 3 * ch
        w = jax.random.normal(next(keys), (ch, in_ch, 3, 3), jnp.float32) * (2.0 / n) ** 0.5
        b = jnp.zeros((ch,), jnp.float32)
        bn = None
        if cfg["conv_batch_norm"]:
            bn = (jnp.ones((ch,)), jnp.zeros((ch,)), jnp.zeros((ch,)), jnp.ones((ch,)))
        conv_blocks.append(dict(w=w, b=b, bn=bn, pool=pool))
        in_ch = ch

    fc_in = cur * cur * cfg["conv_channels"][-1]
    fc_blocks = []
    for width in cfg["fc_layers"][:-1]:
        # nn.Linear weight is (out, in); store transposed (in, out) for x @ w.
        w = jax.random.normal(next(keys), (fc_in, width), jnp.float32) * 0.01
        fc_blocks.append(dict(w=w, b=jnp.zeros((width,), jnp.float32)))
        fc_in = width

    last = cfg["fc_layers"][-1]
    e1 = dict(w=jax.random.normal(next(keys), (fc_in, last), jnp.float32) * 0.01,
              b=jnp.zeros((last,), jnp.float32))
    e2 = dict(w=jax.random.normal(next(keys), (last, cfg["num_classes"]), jnp.float32) * 0.01,
              b=jnp.zeros((cfg["num_classes"],), jnp.float32))
    return dict(conv_blocks=conv_blocks, fc_blocks=fc_blocks, end=(e1, e2))


# ----------------------------------------------------------------------------
# Demo / self-check
# ----------------------------------------------------------------------------
if __name__ == "__main__":
    cfg = dict(input_size=16, num_classes=10,
               conv_channels=[4, 8], max_pool_sizes=[2, 2],
               fc_layers=[32, 16], conv_batch_norm=True,
               init_weights=True, augment_training=False)

    key = jax.random.PRNGKey(0)
    kp, kx, kd = jax.random.split(key, 3)
    params = init_vgg_params(kp, cfg)

    B = 2
    x = jax.random.normal(kx, (B, 3, cfg["input_size"], cfg["input_size"]), jnp.float32)

    # 1) Eval-mode forward (dropout identity, BN running stats) vs. jnp reference.
    out = vgg_forward(params, x, training=False, linear_fn=pallas_linear)
    jax.block_until_ready(out)
    assert out.shape == (B, cfg["num_classes"])
    ref = vgg_forward(params, x, training=False, linear_fn=jnp_linear)
    assert jnp.allclose(out, ref, atol=1e-6, rtol=2e-2), "eval forward mismatch"

    # 2) Conv sanity check: im2col + Pallas matmul (f32 path) vs lax.conv.
    blk0 = params["conv_blocks"][0]
    conv_pallas = conv_block_forward(
        x, dict(blk0, pool=1, bn=None),
        functools.partial(pallas_linear, compute_dtype=jnp.float32))
    conv_ref = jnp.maximum(
        lax.conv_general_dilated(x, blk0["w"], (1, 1), "SAME",
                                 dimension_numbers=("NCHW", "OIHW", "NCHW"))
        + blk0["b"][None, :, None, None], 0.0)
    assert jnp.allclose(conv_pallas, conv_ref, atol=5e-2, rtol=5e-2), "conv mismatch"

    # 3) Training-mode forward: inverted dropout(0.5) masks fused in the kernel
    #    epilogue; masks are generated deterministically so the jnp reference
    #    (same masks) must agree.
    out_tr = vgg_forward(params, x, training=True, rng=kd, linear_fn=pallas_linear)
    jax.block_until_ready(out_tr)
    assert out_tr.shape == (B, cfg["num_classes"])
    ref_tr = vgg_forward(params, x, training=True, rng=kd, linear_fn=jnp_linear)
    assert jnp.allclose(out_tr, ref_tr, atol=1e-6, rtol=2e-2), "train forward mismatch"

    print("KERNEL_OK")
</pallas_src>

<mosaic_0001>
module attributes {stable_mosaic.version = 11 : i64} {
  func.func @_linear_kernel(%arg0: i32, %arg1: i32, %arg2: i32, %arg3: memref<256x128xbf16, #tpu.memory_space<vmem>>, %arg4: memref<128x128xbf16, #tpu.memory_space<vmem>>, %arg5: memref<1x128xf32, #tpu.memory_space<vmem>>, %arg6: memref<256x128xf32, #tpu.memory_space<vmem>>, %arg7: memref<256x128xf32, #tpu.memory_space<vmem>>) attributes {dimension_semantics = [#tpu.dimension_semantics<parallel>, #tpu.dimension_semantics<parallel>, #tpu.dimension_semantics<arbitrary>], iteration_bounds = array<i64: 2, 1, 1>, scalar_prefetch = 0 : i64, scratch_operands = 1 : i64, tpu.core_type = #tpu.core_type<tc>, window_params = [{transform_indices = @transform_0, window_bounds = array<i64: 256, 128>}, {transform_indices = @transform_1, window_bounds = array<i64: 128, 128>}, {transform_indices = @transform_2, window_bounds = array<i64: 1, 128>}, {transform_indices = @transform_3, window_bounds = array<i64: 256, 128>}]} {
    %c0_i32 = arith.constant 0 : i32
    %0 = arith.cmpi eq, %arg2, %c0_i32 : i32
    %1 = arith.extui %0 : i1 to i32
    %c0_i32_0 = arith.constant 0 : i32
    %2 = arith.cmpi ne, %1, %c0_i32_0 : i32
    scf.if %2 {
      %cst_10 = arith.constant 0.000000e+00 : f32
      %12 = vector.broadcast %cst_10 : f32 to vector<256x128xf32>
      %c0_11 = arith.constant 0 : index
      %c0_12 = arith.constant 0 : index
      %13 = vector.load %arg7[%c0_11, %c0_12] : memref<256x128xf32, #tpu.memory_space<vmem>>, vector<256x128xf32>
      tpu.vector_store %arg7[%c0_11, %c0_12], %12 {strides = array<i32>} : memref<256x128xf32, #tpu.memory_space<vmem>>, vector<256x128xf32>,
    } else {
    }
    %c0 = arith.constant 0 : index
    %c0_1 = arith.constant 0 : index
    %3 = vector.load %arg7[%c0, %c0_1] : memref<256x128xf32, #tpu.memory_space<vmem>>, vector<256x128xf32>
    %c0_2 = arith.constant 0 : index
    %c0_3 = arith.constant 0 : index
    %4 = vector.load %arg3[%c0_2, %c0_3] : memref<256x128xbf16, #tpu.memory_space<vmem>>, vector<256x128xbf16>
    %c0_4 = arith.constant 0 : index
    %c0_5 = arith.constant 0 : index
    %5 = vector.load %arg4[%c0_4, %c0_5] : memref<128x128xbf16, #tpu.memory_space<vmem>>, vector<128x128xbf16>
    %cst = arith.constant dense<0.000000e+00> : vector<256x128xf32>
    %6 = tpu.matmul %4, %5, %cst {dimension_numbers = #tpu.dot_dimension_numbers<[1], [0], [0], [1], [0, 0, 1, 1], [], []>} : vector<256x128xbf16>, vector<128x128xbf16>, vector<256x128xf32> -> vector<256x128xf32>
    %7 = arith.addf %3, %6 : vector<256x128xf32>
    %c0_6 = arith.constant 0 : index
    %c0_7 = arith.constant 0 : index
    %8 = vector.load %arg7[%c0_6, %c0_7] : memref<256x128xf32, #tpu.memory_space<vmem>>, vector<256x128xf32>
    tpu.vector_store %arg7[%c0_6, %c0_7], %7 {strides = array<i32>} : memref<256x128xf32, #tpu.memory_space<vmem>>, vector<256x128xf32>,
    %c0_i32_8 = arith.constant 0 : i32
    %9 = arith.cmpi eq, %arg2, %c0_i32_8 : i32
    %10 = arith.extui %9 : i1 to i32
    %c0_i32_9 = arith.constant 0 : i32
    %11 = arith.cmpi ne, %10, %c0_i32_9 : i32
    scf.if %11 {
      %c0_10 = arith.constant 0 : index
      %c0_11 = arith.constant 0 : index
      %12 = vector.load %arg7[%c0_10, %c0_11] : memref<256x128xf32, #tpu.memory_space<vmem>>, vector<256x128xf32>
      %c0_12 = arith.constant 0 : index
      %c0_13 = arith.constant 0 : index
      %13 = vector.load %arg5[%c0_12, %c0_13] : memref<1x128xf32, #tpu.memory_space<vmem>>, vector<1x128xf32>
      %14 = vector.broadcast %13 : vector<1x128xf32> to vector<256x128xf32>
      %15 = arith.addf %12, %14 : vector<256x128xf32>
      %cst_14 = arith.constant 0.000000e+00 : f32
      %16 = vector.broadcast %cst_14 : f32 to vector<256x128xf32>
      %17 = arith.maximumf %15, %16 : vector<256x128xf32>
      %c0_15 = arith.constant 0 : index
      %c0_16 = arith.constant 0 : index
      %18 = vector.load %arg6[%c0_15, %c0_16] : memref<256x128xf32, #tpu.memory_space<vmem>>, vector<256x128xf32>
      tpu.vector_store %arg6[%c0_15, %c0_16], %17 {strides = array<i32>} : memref<256x128xf32, #tpu.memory_space<vmem>>, vector<256x128xf32>,
    } else {
    }
    return
  }
  func.func @transform_0(%arg0: i32, %arg1: i32, %arg2: i32) -> (i32, i32) {
    %c0_i32 = arith.constant 0 : i32
    return %arg0, %arg2 : i32, i32
  }
  func.func @transform_1(%arg0: i32, %arg1: i32, %arg2: i32) -> (i32, i32) {
    %c0_i32 = arith.constant 0 : i32
    return %arg2, %arg1 : i32, i32
  }
  func.func @transform_2(%arg0: i32, %arg1: i32, %arg2: i32) -> (i32, i32) {
    %c0_i32 = arith.constant 0 : i32
    %c0_i32_0 = arith.constant 0 : i32
    return %c0_i32, %arg1 : i32, i32
  }
  func.func @transform_3(%arg0: i32, %arg1: i32, %arg2: i32) -> (i32, i32) {
    %c0_i32 = arith.constant 0 : i32
    return %arg0, %arg1 : i32, i32
  }
}

</mosaic_0001>

<bundles_post_ra>
// kernel: tpu_custom_call.1
= control target key start
LH: loop header
LB: loop body
LE: loop exit
PB: predicated region body
PF: predicated region fallthrough
CT: control target
= control target key end

     0   :  { %s1600_s0 = inlined_call_operand.hbm [shape: bf16[512,128], index: 0, kind: input, shape index: {}]   ;;  %s1601_s1 = inlined_call_operand.hbm [shape: bf16[128,128], index: 1, kind: input, shape index: {}]   ;;  %s1602_s2 = inlined_call_operand.vmem [shape: f32[1,128], index: 2, kind: input, shape index: {}]   ;;  %s1603_s3 = inlined_call_operand.hbm [shape: f32[512,128], index: 3, kind: output, shape index: {}]  }
   0x1   :  { %1605 = sst [smem:[#allocation12_spill]] %s1601_s1 }
   0x2   :  { %8 = vsyncpa [#allocation4], 0 }
   0x3   :  { %10 = vsyncpa [#allocation4 + $0x1], 0 }
   0x4   :  { %11 = vsyncpa [#allocation7], 0 }
   0x5   :  { %12 = vsyncpa [#allocation5], 0 }
   0x6   :  { %14 = vsyncpa [#allocation5 + $0x1], 0  ;;  %s1354_s12 = smov 0   ;;  %s1356_s13 = smov 0  }
   0x7   :  { %s1358_s14 = smov 0   ;;  %s1360_s15 = smov 0  }
   0x8   :  { %s1362_s16 = smov 0   ;;  %s1364_s17 = smov 0  }
   0x9 LB: > { %s939_s18 = sadd.s32 4294967295, %s1327_s17   ;;  %s940_s19 = sadd.s32 4294967294, %s1327_s17   ;;  %s1327_s17 = sphi %s1364_s17, %s20_s17   ;;  %s1323_s16 = sphi %s1362_s16, %s1619_s16   ;;  %s1319_s15 = sphi %s1360_s15, %s1618_s15   ;;  %s1315_s14 = sphi %s1358_s14, %s1617_s14   ;;  %s1311_s13 = sphi %s1356_s13, %s1616_s13   ;;  %s1307_s12 = sphi %s1354_s12, %s1615_s12  }
   0xa   : > { %p61_p0 = scmp.ne.s32.totalorder %s1311_s13, %s1307_s12  ;;  %p1388_p1 = scmp.eq.s32.totalorder %s939_s18, 0 }
   0xb   : > { %p1392_p2 = scmp.eq.s32.totalorder %s939_s18, 1  ;;  %p147_p3 = scmp.eq.s32.totalorder %s940_s19, 1 }
   0xc   : > { %p1398_p4 = por %p1388_p1, %p61_p0  ;;  %p941_p5 = scmp.ge.s32.totalorder %s1327_s17, 1 }
   0xd   : > { %p1403_p6 = por %p147_p3, %p61_p0  ;;  %p154_p7 = scmp.lt.s32.totalorder %s1327_s17, 3 }
   0xe   : > { %s1610_s1 = sld [smem:[#allocation12_spill]]  ;;  %s1329_s28 = smov [#allocation6]  }
   0xf   : > { %p1411_p8 = pnand %p941_p5, %p154_p7  ;;  %s171_s29 = sshll.u32 %s1329_s28, 4  ;;  %s172_s29 = int_to_ptr.vmem [resolvable:$true] %s171_s29 }
  0x10   : > { %p944_p11 = scmp.ge.s32.totalorder %s1327_s17, 2  ;;  %s1604_s30 = smov 64  }
  0x11   : > { %p1111_p9 = pneg %p1411_p8  ;;  %s1331_s4 = smov 4  }
  0x12   : > { %s39_s5 = sadd.s32 1, %s1323_s16  ;;  %s48_s6 = sadd.s32 1, %s1315_s14 }
  0x13   : > { %p1112_p10 = pnand %p1111_p9, %p1388_p1  ;;  %p41_p12 = scmp.ge.s32.totalorder %s39_s5, 2 }
  0x14   : > { %s169_s26 = sshll.u32 %s1610_s1, 4  ;;  %p55_p13 = scmp.ne.s32.totalorder %s1315_s14, %s1311_s13  ;;  %s170_s26 = int_to_ptr.hbm [resolvable:$true] %s169_s26 }
  0x15   : > { %1114 = dma.hbm_to_vmem [thread:$0]  (!%p1112_p10), %s170_s26, 1024, %s172_s29, [#allocation7], %s1604_s30, %s1604_s30, %s1331_s4  }
  0x16   : > { %p56_p0 = scmp.eq.s32.totalorder %s1327_s17, 0  ;;  %s1621_s5 = smov (%p41_p12, %s39_s5), 0 }
  0x17   : > { %p1436_p5 = por %p1392_p2, %p55_p13  ;;  %s43_s9 = ssub.s32 %s1323_s16, %s1621_s5 }
  0x18   : > { %p1430_p3 = por %p56_p0, %p55_p13  ;;  %p1124_p7 = scmp.lt.s32.totalorder %s1327_s17, 2 }
  0x19   : > { %p46_p9 = scmp.eq.s32.totalorder %s43_s9, 0  ;;  %s191_s10 = sand.u32 1, %s1315_s14  }
  0x1a   : > { %s945_s11 = sshll.u32 %s191_s10, 7  ;;  %s1053_s19 = sshll.u32 %s1323_s16, 7 }
  0x1b   : > { %s1445_s18 = scalar_select %p46_p9, %s1315_s14, %s48_s6  }
  0x1c   : > { %s201_s26 = scalar_lea.hbm %s1600_s0, %s1053_s19  ;;  %s195_s28 = scalar_lea.vmem [#allocation3], %s945_s11 }
  0x1d   : > { %s204_s29 = sshll.u32 %s195_s28, 4  ;;  %s202_s21 = sshll.u32 %s201_s26, 4  ;;  %s205_s29 = int_to_ptr.vmem [resolvable:$true] %s204_s29  ;;  %s203_s21 = int_to_ptr.hbm [resolvable:$true] %s202_s21 }
  0x1e   : > { %p1116_p2 = pnand %p1124_p7, %p1430_p3  ;;  %s192_s30 = scalar_lea.sflag [#allocation4], %s191_s10 }
  0x1f   : > { %s1614_s1 = smov 64   ;;  %216 = sbr.rel (%p1411_p8) target bundleno = 269 (0x10d), region = 32 }
  0x20   : > { %1118 = dma.hbm_to_vmem [thread:$0]  (!%p1116_p2), %s203_s21, 2048, %s205_s29, %s192_s30, %s1614_s1, %s1614_s1, %s1331_s4  }
  0x21   : > { %s1459_s6 = sand.u32 (!%p1411_p8), 1, %s1311_s13  }
  0x22   : > { %s949_s9 = sshll.u32 (!%p1411_p8), %s1459_s6, 7  ;;  %s219_s11 = scalar_lea.sflag (!%p1411_p8), [#allocation4], %s1459_s6 }
  0x23   : > { %s1463_s19 = scalar_lea.vmem (!%p1411_p8), [#allocation3], %s949_s9 }
  0x24   : > { %1294 = dma.done.wait (%p1398_p4), %s219_s11, 2048  }
  0x25   : > { %1296 = vsyncadd (%p1398_p4), %s219_s11, 4294965248 }
  0x26   : > { %1298 = dma.done.wait (%p1388_p1), [#allocation7], 1024  }
  0x27   : > { %1300 = vsyncadd (%p1388_p1), [#allocation7], 4294966272  ;;  %v1077_v0 = vld [vmem:[#allocation6 + $0x38] sm:$0xff]  ;;  %v1076_v1 = vld [vmem:[#allocation6 + $0x30] sm:$0xff]  ;;  %s951_s22 = sshll.u32 %s1459_s6, 8  ;;  %s1078_s30 = sshll.u32 %s1319_s15, 8 }
  0x28   : > { %520 = vmatpush.bf16.msra.mxu0 %v1077_v0  ;;  %1079 = vmatpush.bf16.msra.mxu1 %v1077_v0  ;;  %v1075_v2 = vld [vmem:[#allocation6 + $0x28] sm:$0xff]  ;;  %v1074_v3 = vld [vmem:[#allocation6 + $0x20] sm:$0xff]  ;;  %v1073_v4 = vld [vmem:[#allocation6 + $0x18] sm:$0xff]  ;;  %s1497_s27 = scalar_lea.vmem [#allocation8], %s951_s22  ;;  %s821_s10 = scalar_lea.hbm %s1603_s3, %s1078_s30 }
  0x29   : > { %1080 = vmatpush.bf16.msra.mxu2 %v1077_v0  ;;  %1081 = vmatpush.bf16.msra.mxu3 %v1077_v0  ;;  %v1072_v5 = vld [vmem:[#allocation6 + $0x10] sm:$0xff]  ;;  %v1071_v6 = vld [vmem:[#allocation6 + $0x8] sm:$0xff]  ;;  %v1070_v7 = vld [vmem:[#allocation6] sm:$0xff]  ;;  %s822_s24 = sshll.u32 %s1497_s27, 4  ;;  %s824_s15 = sshll.u32 %s821_s10, 4  ;;  %s823_s24 = int_to_ptr.vmem [resolvable:$true] %s822_s24  ;;  %s825_s15 = int_to_ptr.hbm [resolvable:$true] %s824_s15 }
  0x2a   : > { %v1054_v8 = vld [vmem:[%s1463_s19] sm:$0xff]  ;;  %v1055_v12 = vld [vmem:[%s1463_s19 + $0x8] sm:$0xff]  ;;  %v1056_v16 = vld [vmem:[%s1463_s19 + $0x10] sm:$0xff]  ;;  %s809_s25 = scalar_lea.sflag [#allocation5], %s1459_s6  ;;  %s1255_s26 = sshra.s32 %s825_s15, 4  ;;  %s1256_s26 = int_to_ptr.hbm [resolvable:$true] %s1255_s26 }
  0x2b   : > { %v1058_v9 = vld [vmem:[%s1463_s19 + $0x20] sm:$0xff]  ;;  %v1059_v13 = vld [vmem:[%s1463_s19 + $0x28] sm:$0xff]  ;;  %v1060_v17 = vld [vmem:[%s1463_s19 + $0x30] sm:$0xff]  ;;  %s1257_s28 = scalar_lea.hbm %s1256_s26, 256  ;;  %s1261_s9 = scalar_lea.hbm %s1603_s3, 512 }
  0x2c   : > { %521 = vmatpush.bf16.msra.mxu0 %v1076_v1  ;;  %1082 = vmatpush.bf16.msra.mxu1 %v1076_v1  ;;  %v1062_v10 = vld [vmem:[%s1463_s19 + $0x40] sm:$0xff]  ;;  %v1063_v14 = vld [vmem:[%s1463_s19 + $0x48] sm:$0xff]  ;;  %v1064_v18 = vld [vmem:[%s1463_s19 + $0x50] sm:$0xff]  ;;  %p1258_p1 = scmp.ne.s32.totalorder %s1256_s26, %s1257_s28  ;;  %p1262_p10 = scmp.lt.s32.totalorder %s1256_s26, %s1603_s3 }
  0x2d   : > { %1083 = vmatpush.bf16.msra.mxu2 %v1076_v1  ;;  %1084 = vmatpush.bf16.msra.mxu3 %v1076_v1  ;;  %v1066_v11 = vld [vmem:[%s1463_s19 + $0x60] sm:$0xff]  ;;  %v1067_v15 = vld [vmem:[%s1463_s19 + $0x68] sm:$0xff]  ;;  %v1068_v19 = vld [vmem:[%s1463_s19 + $0x70] sm:$0xff]  ;;  %p1263_p12 = scmp.lt.s32.totalorder %s1261_s9, %s1257_s28 }
  0x2e   : > { %v1057_v20 = vld [vmem:[%s1463_s19 + $0x18] sm:$0xff]  ;;  %v1492_v24 = vld [vmem:[%s1602_s2] ss:$0 sm:$0xff]  ;;  %p1259_p4 = pnand %p1258_p1, %p1436_p5 }
  0x2f   : > { %v1061_v21 = vld [vmem:[%s1463_s19 + $0x38] sm:$0xff]  ;;  %p1264_p13 = por %p1263_p12, %p1262_p10 }
  0x30   : > { %522 = vmatpush.bf16.msra.mxu0 %v1075_v2  ;;  %1085 = vmatpush.bf16.msra.mxu1 %v1075_v2  ;;  %v1065_v22 = vld [vmem:[%s1463_s19 + $0x58] sm:$0xff]  ;;  %p1260_p8 = pneg %p1259_p4 }
  0x31   : > { %1086 = vmatpush.bf16.msra.mxu2 %v1075_v2  ;;  %1087 = vmatpush.bf16.msra.mxu3 %v1075_v2  ;;  %v1069_v23 = vld [vmem:[%s1463_s19 + $0x78] sm:$0xff] }
  0x32   : > { %p1265_p0 = pnand %p1264_p13, %p1260_p8 }
  0x34   : > { %523 = vmatpush.bf16.msra.mxu0 %v1074_v3  ;;  %1088 = vmatpush.bf16.msra.mxu1 %v1074_v3 }
  0x35   : > { %1089 = vmatpush.bf16.msra.mxu2 %v1074_v3  ;;  %1090 = vmatpush.bf16.msra.mxu3 %v1074_v3 }
  0x38   : > { %524 = vmatpush.bf16.msra.mxu0 %v1073_v4  ;;  %1091 = vmatpush.bf16.msra.mxu1 %v1073_v4 }
  0x39   : > { %1092 = vmatpush.bf16.msra.mxu2 %v1073_v4  ;;  %1093 = vmatpush.bf16.msra.mxu3 %v1073_v4 }
  0x3c   : > { %525 = vmatpush.bf16.msra.mxu0 %v1072_v5  ;;  %1094 = vmatpush.bf16.msra.mxu1 %v1072_v5 }
  0x3d   : > { %1095 = vmatpush.bf16.msra.mxu2 %v1072_v5  ;;  %1096 = vmatpush.bf16.msra.mxu3 %v1072_v5 }
  0x40   : > { %526 = vmatpush.bf16.msra.mxu0 %v1071_v6  ;;  %1097 = vmatpush.bf16.msra.mxu1 %v1071_v6 }
  0x41   : > { %1098 = vmatpush.bf16.msra.mxu2 %v1071_v6  ;;  %1099 = vmatpush.bf16.msra.mxu3 %v1071_v6 }
  0x44   : > { %527 = vmatpush.bf16.msra.mxu0 %v1070_v7  ;;  %1100 = vmatpush.bf16.msra.mxu1 %v1070_v7 }
  0x45   : > { %1101 = vmatpush.bf16.msra.mxu2 %v1070_v7  ;;  %1102 = vmatpush.bf16.msra.mxu3 %v1070_v7 }
  0x47   : > { %528 = vmatmul.bf16.vlgmr.msra.gmra.mxu0 %v1054_v8  ;;  %548 = vmatmul.bf16.vlgmr.msra.gmra.mxu1 %v1058_v9 }
  0x48   : > { %568 = vmatmul.bf16.vlgmr.msra.gmra.mxu2 %v1062_v10  ;;  %588 = vmatmul.bf16.vlgmr.msra.gmra.mxu3 %v1066_v11 }
  0x57   : > { %533 = vmatmul.bf16.gmra.mxu0 %v1055_v12  ;;  %553 = vmatmul.bf16.gmra.mxu1 %v1059_v13 }
  0x58   : > { %573 = vmatmul.bf16.gmra.mxu2 %v1063_v14  ;;  %593 = vmatmul.bf16.gmra.mxu3 %v1067_v15 }
  0x67   : > { %538 = vmatmul.bf16.gmra.mxu0 %v1056_v16  ;;  %558 = vmatmul.bf16.gmra.mxu1 %v1060_v17 }
  0x68   : > { %578 = vmatmul.bf16.gmra.mxu2 %v1064_v18  ;;  %598 = vmatmul.bf16.gmra.mxu3 %v1068_v19 }
  0x77   : > { %543 = vmatmul.bf16.gmra.mxu0 %v1057_v20  ;;  %563 = vmatmul.bf16.gmra.mxu1 %v1061_v21 }
  0x78   : > { %583 = vmatmul.bf16.gmra.mxu2 %v1065_v22  ;;  %603 = vmatmul.bf16.gmra.mxu3 %v1069_v23 }
  0xc4   : > { %v529_v25 = vpop.f32.mrf.mxu0  ;;  %v549_v26 = vpop.f32.mrf.mxu1 }
  0xc5   : > { %v712_v27 = vadd.f32 %v1492_v24, %v529_v25  ;;  %v720_v28 = vadd.f32 %v1492_v24, %v549_v26 }
  0xc7   : > { %v744_v29 = vmax.f32 %v712_v27, 0.0  ;;  %v752_v30 = vmax.f32 %v720_v28, 0.0 }
  0xc9   : > { %776 = vst [vmem:[%s1497_s27] sm:$0xff] %v744_v29 }
  0xca   : > { %784 = vst [vmem:[%s1497_s27 + $0x40] sm:$0xff] %v752_v30 }
  0xcb   : > { %v569_v31 = vpop.f32.mrf.mxu2  ;;  %v589_v32 = vpop.f32.mrf.mxu3 }
  0xcc   : > { %v728_v33 = vadd.f32 %v1492_v24, %v569_v31  ;;  %v736_v34 = vadd.f32 %v1492_v24, %v589_v32  ;;  %v531_v35 = vpop.f32.mrf.mxu0  ;;  %v551_v36 = vpop.f32.mrf.mxu1 }
  0xcd   : > { %v713_v37 = vadd.f32 %v1492_v24, %v531_v35  ;;  %v721_v38 = vadd.f32 %v1492_v24, %v551_v36 }
  0xce   : > { %v760_v39 = vmax.f32 %v728_v33, 0.0  ;;  %v768_v40 = vmax.f32 %v736_v34, 0.0 }
  0xcf   : > { %v745_v41 = vmax.f32 %v713_v37, 0.0  ;;  %v753_v42 = vmax.f32 %v721_v38, 0.0 }
  0xd0   : > { %792 = vst [vmem:[%s1497_s27 + $0x80] sm:$0xff] %v760_v39 }
  0xd1   : > { %800 = vst [vmem:[%s1497_s27 + $0xc0] sm:$0xff] %v768_v40 }
  0xd2   : > { %777 = vst [vmem:[%s1497_s27 + $0x8] sm:$0xff] %v745_v41 }
  0xd3   : > { %785 = vst [vmem:[%s1497_s27 + $0x48] sm:$0xff] %v753_v42  ;;  %v571_v43 = vpop.f32.mrf.mxu2  ;;  %v591_v44 = vpop.f32.mrf.mxu3 }
  0xd4   : > { %v729_v45 = vadd.f32 %v1492_v24, %v571_v43  ;;  %v737_v46 = vadd.f32 %v1492_v24, %v591_v44  ;;  %v534_v47 = vpop.f32.mrf.mxu0  ;;  %v554_v48 = vpop.f32.mrf.mxu1 }
  0xd5   : > { %v714_v49 = vadd.f32 %v1492_v24, %v534_v47  ;;  %v722_v50 = vadd.f32 %v1492_v24, %v554_v48 }
  0xd6   : > { %v761_v51 = vmax.f32 %v729_v45, 0.0  ;;  %v769_v52 = vmax.f32 %v737_v46, 0.0 }
  0xd7   : > { %v746_v53 = vmax.f32 %v714_v49, 0.0  ;;  %v754_v54 = vmax.f32 %v722_v50, 0.0 }
  0xd8   : > { %793 = vst [vmem:[%s1497_s27 + $0x88] sm:$0xff] %v761_v51 }
  0xd9   : > { %801 = vst [vmem:[%s1497_s27 + $0xc8] sm:$0xff] %v769_v52 }
  0xda   : > { %778 = vst [vmem:[%s1497_s27 + $0x10] sm:$0xff] %v746_v53 }
  0xdb   : > { %786 = vst [vmem:[%s1497_s27 + $0x50] sm:$0xff] %v754_v54  ;;  %v574_v55 = vpop.f32.mrf.mxu2  ;;  %v594_v56 = vpop.f32.mrf.mxu3 }
  0xdc   : > { %v730_v57 = vadd.f32 %v1492_v24, %v574_v55  ;;  %v738_v58 = vadd.f32 %v1492_v24, %v594_v56  ;;  %v536_v59 = vpop.f32.mrf.mxu0  ;;  %v556_v60 = vpop.f32.mrf.mxu1 }
  0xdd   : > { %v715_v61 = vadd.f32 %v1492_v24, %v536_v59  ;;  %v723_v62 = vadd.f32 %v1492_v24, %v556_v60 }
  0xde   : > { %v762_v63 = vmax.f32 %v730_v57, 0.0  ;;  %v770_v0 = vmax.f32 %v738_v58, 0.0 }
  0xdf   : > { %v747_v1 = vmax.f32 %v715_v61, 0.0  ;;  %v755_v2 = vmax.f32 %v723_v62, 0.0 }
  0xe0   : > { %794 = vst [vmem:[%s1497_s27 + $0x90] sm:$0xff] %v762_v63 }
  0xe1   : > { %802 = vst [vmem:[%s1497_s27 + $0xd0] sm:$0xff] %v770_v0 }
  0xe2   : > { %779 = vst [vmem:[%s1497_s27 + $0x18] sm:$0xff] %v747_v1 }
  0xe3   : > { %787 = vst [vmem:[%s1497_s27 + $0x58] sm:$0xff] %v755_v2  ;;  %v576_v3 = vpop.f32.mrf.mxu2  ;;  %v596_v4 = vpop.f32.mrf.mxu3 }
  0xe4   : > { %v731_v5 = vadd.f32 %v1492_v24, %v576_v3  ;;  %v739_v6 = vadd.f32 %v1492_v24, %v596_v4  ;;  %v539_v7 = vpop.f32.mrf.mxu0  ;;  %v559_v8 = vpop.f32.mrf.mxu1 }
  0xe5   : > { %v716_v9 = vadd.f32 %v1492_v24, %v539_v7  ;;  %v724_v10 = vadd.f32 %v1492_v24, %v559_v8 }
  0xe6   : > { %v763_v11 = vmax.f32 %v731_v5, 0.0  ;;  %v771_v12 = vmax.f32 %v739_v6, 0.0 }
  0xe7   : > { %v748_v13 = vmax.f32 %v716_v9, 0.0  ;;  %v756_v14 = vmax.f32 %v724_v10, 0.0 }
  0xe8   : > { %795 = vst [vmem:[%s1497_s27 + $0x98] sm:$0xff] %v763_v11 }
  0xe9   : > { %803 = vst [vmem:[%s1497_s27 + $0xd8] sm:$0xff] %v771_v12 }
  0xea   : > { %780 = vst [vmem:[%s1497_s27 + $0x20] sm:$0xff] %v748_v13 }
  0xeb   : > { %788 = vst [vmem:[%s1497_s27 + $0x60] sm:$0xff] %v756_v14  ;;  %v579_v15 = vpop.f32.mrf.mxu2  ;;  %v599_v16 = vpop.f32.mrf.mxu3 }
  0xec   : > { %v732_v17 = vadd.f32 %v1492_v24, %v579_v15  ;;  %v740_v18 = vadd.f32 %v1492_v24, %v599_v16  ;;  %v541_v19 = vpop.f32.mrf.mxu0  ;;  %v561_v20 = vpop.f32.mrf.mxu1 }
  0xed   : > { %v717_v21 = vadd.f32 %v1492_v24, %v541_v19  ;;  %v725_v22 = vadd.f32 %v1492_v24, %v561_v20 }
  0xee   : > { %v764_v23 = vmax.f32 %v732_v17, 0.0  ;;  %v772_v25 = vmax.f32 %v740_v18, 0.0 }
  0xef   : > { %v749_v26 = vmax.f32 %v717_v21, 0.0  ;;  %v757_v27 = vmax.f32 %v725_v22, 0.0 }
  0xf0   : > { %796 = vst [vmem:[%s1497_s27 + $0xa0] sm:$0xff] %v764_v23 }
  0xf1   : > { %804 = vst [vmem:[%s1497_s27 + $0xe0] sm:$0xff] %v772_v25 }
  0xf2   : > { %781 = vst [vmem:[%s1497_s27 + $0x28] sm:$0xff] %v749_v26 }
  0xf3   : > { %789 = vst [vmem:[%s1497_s27 + $0x68] sm:$0xff] %v757_v27  ;;  %v581_v28 = vpop.f32.mrf.mxu2  ;;  %v601_v29 = vpop.f32.mrf.mxu3 }
  0xf4   : > { %v733_v30 = vadd.f32 %v1492_v24, %v581_v28  ;;  %v741_v31 = vadd.f32 %v1492_v24, %v601_v29  ;;  %v544_v32 = vpop.f32.mrf.mxu0  ;;  %v564_v33 = vpop.f32.mrf.mxu1 }
  0xf5   : > { %v718_v34 = vadd.f32 %v1492_v24, %v544_v32  ;;  %v726_v35 = vadd.f32 %v1492_v24, %v564_v33 }
  0xf6   : > { %v765_v36 = vmax.f32 %v733_v30, 0.0  ;;  %v773_v37 = vmax.f32 %v741_v31, 0.0 }
  0xf7   : > { %v750_v38 = vmax.f32 %v718_v34, 0.0  ;;  %v758_v39 = vmax.f32 %v726_v35, 0.0 }
  0xf8   : > { %797 = vst [vmem:[%s1497_s27 + $0xa8] sm:$0xff] %v765_v36 }
  0xf9   : > { %805 = vst [vmem:[%s1497_s27 + $0xe8] sm:$0xff] %v773_v37 }
  0xfa   : > { %782 = vst [vmem:[%s1497_s27 + $0x30] sm:$0xff] %v750_v38 }
  0xfb   : > { %790 = vst [vmem:[%s1497_s27 + $0x70] sm:$0xff] %v758_v39  ;;  %v584_v40 = vpop.f32.mrf.mxu2  ;;  %v604_v41 = vpop.f32.mrf.mxu3 }
  0xfc   : > { %v734_v42 = vadd.f32 %v1492_v24, %v584_v40  ;;  %v742_v43 = vadd.f32 %v1492_v24, %v604_v41  ;;  %v546_v44 = vpop.f32.mrf.mxu0  ;;  %v566_v45 = vpop.f32.mrf.mxu1 }
  0xfd   : > { %v719_v46 = vadd.f32 %v1492_v24, %v546_v44  ;;  %v727_v47 = vadd.f32 %v1492_v24, %v566_v45 }
  0xfe   : > { %v766_v48 = vmax.f32 %v734_v42, 0.0  ;;  %v774_v49 = vmax.f32 %v742_v43, 0.0 }
  0xff   : > { %v751_v50 = vmax.f32 %v719_v46, 0.0  ;;  %v759_v51 = vmax.f32 %v727_v47, 0.0 }
 0x100   : > { %798 = vst [vmem:[%s1497_s27 + $0xb0] sm:$0xff] %v766_v48 }
 0x101   : > { %806 = vst [vmem:[%s1497_s27 + $0xf0] sm:$0xff] %v774_v49 }
 0x102   : > { %783 = vst [vmem:[%s1497_s27 + $0x38] sm:$0xff] %v751_v50 }
 0x103   : > { %791 = vst [vmem:[%s1497_s27 + $0x78] sm:$0xff] %v759_v51  ;;  %v586_v52 = vpop.f32.mrf.mxu2  ;;  %v606_v53 = vpop.f32.mrf.mxu3 }
 0x104   : > { %v735_v54 = vadd.f32 %v1492_v24, %v586_v52  ;;  %v743_v55 = vadd.f32 %v1492_v24, %v606_v53 }
 0x106   : > { %v767_v56 = vmax.f32 %v735_v54, 0.0  ;;  %v775_v57 = vmax.f32 %v743_v55, 0.0 }
 0x108   : > { %799 = vst [vmem:[%s1497_s27 + $0xb8] sm:$0xff] %v767_v56 }
 0x109   : > { %807 = vst [vmem:[%s1497_s27 + $0xf8] sm:$0xff] %v775_v57 }
 0x10a   : > { %1268 = shalt.err (!%p1265_p0)
}
 0x10b   : > { %s1332_s6 = smov 128   ;;  %s1333_s1 = smov 8  }
 0x10c   : > { %1109 = dma.vmem_to_hbm [thread:$0]  (%p1436_p5), %s823_s24, 4096, %s825_s15, %s809_s25, %s1332_s6, %s1332_s6, %s1333_s1  }
 0x10d PF: > { %s839_s20 = sand.u32 1, %s1307_s12   ;;  %p1120_p3 = pnand %p944_p11, %p1403_p6 }
 0x10e   : > { %s840_s22 = scalar_lea.sflag [#allocation5], %s839_s20 }
 0x10f   : > { %p1121_p7 = pneg %p1120_p3 }
 0x111   : > { %1302 = dma.done.wait (%p1121_p7), %s840_s22, 4096  }
 0x112   : > { %1304 = vsyncadd (%p1121_p7), %s840_s22, 4294963200  ;;  %s20_s17 = sadd.s32 1, %s1327_s17   ;;  %s1615_s12 = smov %s1311_s13 }
 0x113   : > { %p17_p9 = scmp.ge.s32.totalorder %s20_s17, 4   ;;  %s1616_s13 = smov %s1315_s14 }
 0x114   : > { %s1617_s14 = smov %s1445_s18  ;;  %s1618_s15 = smov %s1323_s16 }
 0x115   : > { %s1619_s16 = smov %s1621_s5  ;;  %19 = sbr.rel (!%p17_p9) target bundleno = 9 (0x9), region = 93 }
 0x11a   :  { %846 = vsyncpa [#allocation4], 1 }
 0x11b   :  { %848 = vsyncpa [#allocation4 + $0x1], 1 }
 0x11c   :  { %849 = vsyncpa [#allocation7], 1 }
 0x11d   :  { %850 = vsyncpa [#allocation5], 1 }
 0x11e   :  { %852 = vsyncpa [#allocation5 + $0x1], 1 }

</bundles_post_ra>
